<compile_context>
chip_gen: v5e
topology: v5e:2x2
jax: 0.10.0
libtpu: 0.0.40
codegen_flags: <defaults>
</compile_context>

<pallas_src>
import functools
import math

import jax
import jax.numpy as jnp
from jax.experimental import pallas as pl
from jax.experimental.pallas import tpu as pltpu


def _fused_heads_kernel(x_ref, wq_ref, wk_ref, wv_ref, bq_ref, bk_ref, bv_ref,
                        o_ref, k_scr, v_scr,
                        *, num_heads, head_dim, q_tile, exp_in_bf16):
    qi = pl.program_id(1)
    H, Dh = num_heads, head_dim

    # ---- K / V projections: once per batch element, stored head-major (H, S, Dh)
    #      in bf16 scratch and reused across all query tiles of this batch element.
    @pl.when(qi == 0)
    def _():
        x_full = x_ref[...]                                           # (S, E) bf16
        k = jnp.dot(x_full, wk_ref[...],
                    preferred_element_type=jnp.float32) + bk_ref[...]
        v = jnp.dot(x_full, wv_ref[...],
                    preferred_element_type=jnp.float32) + bv_ref[...]
        kb = k.astype(jnp.bfloat16)                                   # (S, H*Dh)
        vb = v.astype(jnp.bfloat16)
        for h in range(H):                                            # static unroll
            lo = h * Dh
            k_scr[h] = kb[:, lo:lo + Dh]
            v_scr[h] = vb[:, lo:lo + Dh]

    # ---- Q projection for this query tile (1/sqrt(Dh) pre-folded into wq / bq).
    row0 = pl.multiple_of(qi * q_tile, q_tile)
    xq = x_ref[pl.ds(row0, q_tile), :]                                # (tq, E) bf16
    q = jnp.dot(xq, wq_ref[...],
                preferred_element_type=jnp.float32) + bq_ref[...]     # (tq, H*Dh) f32
    qb = q.astype(jnp.bfloat16)
    q3 = jnp.stack([qb[:, h * Dh:(h + 1) * Dh] for h in range(H)],
                   axis=0)                                            # (H, tq, Dh)

    # ---- Attention batched over heads: one MXU stream, no per-head lane shuffles.
    s = jnp.einsum('hqd,hkd->hqk', q3, k_scr[...],
                   preferred_element_type=jnp.float32)                # (H, tq, S) f32
    m = jnp.max(s, axis=-1, keepdims=True)
    e = s - m
    if exp_in_bf16:
        # EUP bf16 rate on v6e/v7x; also skips the later p->bf16 cast for the PV matmul.
        p = jnp.exp(e.astype(jnp.bfloat16))
        denom = jnp.sum(p.astype(jnp.float32), axis=-1, keepdims=True)
        p_mm = p
    else:
        p = jnp.exp(e)                                                # f32 (v5e-safe)
        denom = jnp.sum(p, axis=-1, keepdims=True)
        p_mm = p.astype(jnp.bfloat16)
    o = jnp.einsum('hqk,hkd->hqd', p_mm, v_scr[...],
                   preferred_element_type=jnp.float32)                # (H, tq, Dh) f32
    o = o * pl.reciprocal(denom, approx=True)                         # deferred norm

    # ---- Per-head writes straight into the lane-dense (tq, H*Dh) output block.
    for h in range(H):
        lo = h * Dh
        o_ref[:, lo:lo + Dh] = o[h].astype(o_ref.dtype)


def _vmem_limit_bytes():
    """~75% of physical VMEM: 96 MiB on v5e/v6e (128 MiB), 48 MiB on v7x (64 MiB)."""
    try:
        cap = int(pltpu.get_tpu_info().vmem_capacity_bytes)
    except Exception:          # query unavailable -> assume the smallest (v7x)
        cap = 64 * 1024 * 1024
    return max(32 * 1024 * 1024, (cap * 3) // 4)


def _pick_q_tile(S, E, HD, num_heads, vmem_limit):
    """256 fills the 256-row MXU on v6e/v7x; shrink only if the per-tile f32
    score/prob intermediates + resident K/V + weights would blow the VMEM budget."""
    # TODO(synk): prefer 128 on v5e (128x128 MXU) once the chip generation is
    # queryable here; add K/V-axis tiling with an online-softmax accumulator for
    # very long S instead of only shrinking the query tile.
    if S <= 256:
        return S
    head_dim = HD // num_heads
    kv_lane = ((head_dim + 127) // 128) * 128        # VMEM lane padding of Dh
    budget = int(vmem_limit * 0.8)
    candidates = [tq for tq in (256, 128, 64, 32, 16, 8) if S % tq == 0]
    for tq in candidates:
        footprint = (
            2 * S * E * 2                            # double-buffered bf16 x block
            + 3 * E * HD * 2                         # single-buffered bf16 weights
            + 2 * tq * HD * 4                        # double-buffered f32 out block
            + 2 * num_heads * S * kv_lane * 2        # bf16 K/V head-major scratch
            + 2 * num_heads * tq * S * 4)            # f32 scores + probs temporaries
        if footprint <= budget:
            return tq
    return candidates[-1] if candidates else S


def attention_heads(x, wq, wk, wv, bq, bk, bv, *, num_heads,
                    q_tile=None, exp_in_bf16=False):
    """Fused bank of AttentionHead modules.

    x:  [B, S, E]
    wq/wk/wv: [E, H*Dh]   (per-head weights concatenated along the output dim)
    bq/bk/bv: [1, H*Dh]
    returns:  [B, S, H*Dh]  == concat_h AttentionHead_h(x)
    """
    B, S, E = x.shape
    HD = wq.shape[1]
    assert HD % num_heads == 0
    head_dim = HD // num_heads
    # Keep H*Dh a multiple of 128 for lane-dense stores.
    # TODO(synk): zero-pad HD to 128 for an H==1 / Dh<128 configuration.
    scale = 1.0 / math.sqrt(head_dim)

    vmem_limit = _vmem_limit_bytes()
    if q_tile is None:
        q_tile = _pick_q_tile(S, E, HD, num_heads, vmem_limit)
    assert S % q_tile == 0, "S must be divisible by the query tile"
    assert q_tile == S or q_tile % 8 == 0, "query tile must be sublane aligned"
    n_q = S // q_tile

    # Host-side prep: bf16 activations/weights for the MXU; fold 1/sqrt(Dh) into
    # the Q projection so the kernel never multiplies by the scale.
    x_b = x.astype(jnp.bfloat16)
    wq_b = (wq * scale).astype(jnp.bfloat16)
    wk_b = wk.astype(jnp.bfloat16)
    wv_b = wv.astype(jnp.bfloat16)
    bq_s = (bq * scale).astype(jnp.float32)
    bk_f = bk.astype(jnp.float32)
    bv_f = bv.astype(jnp.float32)

    kernel = functools.partial(
        _fused_heads_kernel, num_heads=num_heads, head_dim=head_dim,
        q_tile=q_tile, exp_in_bf16=exp_in_bf16)

    # Constant-index weight/bias blocks: single-buffered (double-buffering them is
    # pure VMEM waste, ~3-6 MiB for BERT-base/large).
    w_spec = pl.BlockSpec((E, HD), lambda b, qi: (0, 0),
                          pipeline_mode=pl.Buffered(1))
    b_spec = pl.BlockSpec((1, HD), lambda b, qi: (0, 0),
                          pipeline_mode=pl.Buffered(1))

    return pl.pallas_call(
        kernel,
        out_shape=jax.ShapeDtypeStruct((B, S, HD), x.dtype),
        grid_spec=pltpu.PrefetchScalarGridSpec(
            num_scalar_prefetch=0,
            grid=(B, n_q),
            in_specs=[
                pl.BlockSpec((pl.Squeezed(), S, E), lambda b, qi: (b, 0, 0)),
                w_spec, w_spec, w_spec,
                b_spec, b_spec, b_spec,
            ],
            out_specs=pl.BlockSpec((pl.Squeezed(), q_tile, HD),
                                   lambda b, qi: (b, qi, 0)),
            scratch_shapes=[
                pltpu.VMEM((num_heads, S, head_dim), jnp.bfloat16),  # K (head-major)
                pltpu.VMEM((num_heads, S, head_dim), jnp.bfloat16),  # V (head-major)
            ],
        ),
        # qi axis MUST stay "arbitrary": K/V scratch is filled at qi == 0.
        compiler_params=pltpu.CompilerParams(
            dimension_semantics=("parallel", "arbitrary"),
            vmem_limit_bytes=vmem_limit,
        ),
    )(x_b, wq_b, wk_b, wv_b, bq_s, bk_f, bv_f)


def _reference(x, wq, wk, wv, bq, bk, bv, num_heads):
    """Pure-JAX f32 reference: concat_h AttentionHead_h(x)."""
    q = x @ wq + bq
    k = x @ wk + bk
    v = x @ wv + bv
    HD = q.shape[-1]
    Dh = HD // num_heads
    outs = []
    for h in range(num_heads):
        sl = slice(h * Dh, (h + 1) * Dh)
        qh, kh, vh = q[..., sl], k[..., sl], v[..., sl]
        s = jnp.einsum("bqd,bkd->bqk", qh, kh) / jnp.sqrt(jnp.float32(Dh))
        w = jax.nn.softmax(s, axis=-1)
        outs.append(jnp.einsum("bqk,bkd->bqd", w, vh))
    return jnp.concatenate(outs, axis=-1)


if __name__ == "__main__":
    # Small shapes consistent with the module (scaled-down BERT):
    # batch=2, seq=16, embed=128, heads=2, head_dim=64 (H*Dh = 128 -> lane-dense).
    B, S, E, H, Dh = 2, 16, 128, 2, 64
    HD = H * Dh

    key = jax.random.PRNGKey(0)
    kx, kq, kk, kv, kbq, kbk, kbv = jax.random.split(key, 7)

    x = jax.random.normal(kx, (B, S, E), dtype=jnp.float32)

    # nn.Linear-style init: U(-1/sqrt(in), 1/sqrt(in)); per-head weights concatenated.
    bound = 1.0 / math.sqrt(E)
    wq = jax.random.uniform(kq, (E, HD), jnp.float32, -bound, bound)
    wk = jax.random.uniform(kk, (E, HD), jnp.float32, -bound, bound)
    wv = jax.random.uniform(kv, (E, HD), jnp.float32, -bound, bound)
    bq = jax.random.uniform(kbq, (1, HD), jnp.float32, -bound, bound)
    bk = jax.random.uniform(kbk, (1, HD), jnp.float32, -bound, bound)
    bv = jax.random.uniform(kbv, (1, HD), jnp.float32, -bound, bound)

    # Default q_tile (= S here, never the grid-overhead-dominated tiny tiles).
    out = attention_heads(x, wq, wk, wv, bq, bk, bv, num_heads=H)
    out = jax.block_until_ready(out)

    ref = _reference(x, wq, wk, wv, bq, bk, bv, H)
    assert out.shape == (B, S, HD)
    # bf16 x/weights on the MXU + approx reciprocal -> looser tolerance vs f32 ref.
    assert jnp.allclose(out, ref, atol=3e-2, rtol=3e-2), "mismatch vs reference"

    print("KERNEL_OK")
</pallas_src>

<mosaic_0001>
module attributes {stable_mosaic.version = 11 : i64} {
  func.func @_fused_heads_kernel(%arg0: i32, %arg1: i32, %arg2: memref<1x16x128xbf16, #tpu.memory_space<vmem>>, %arg3: memref<128x128xbf16, #tpu.memory_space<vmem>>, %arg4: memref<128x128xbf16, #tpu.memory_space<vmem>>, %arg5: memref<128x128xbf16, #tpu.memory_space<vmem>>, %arg6: memref<1x128xf32, #tpu.memory_space<vmem>>, %arg7: memref<1x128xf32, #tpu.memory_space<vmem>>, %arg8: memref<1x128xf32, #tpu.memory_space<vmem>>, %arg9: memref<1x16x128xf32, #tpu.memory_space<vmem>>, %arg10: memref<2x16x64xbf16, #tpu.memory_space<vmem>>, %arg11: memref<2x16x64xbf16, #tpu.memory_space<vmem>>) attributes {dimension_semantics = [#tpu.dimension_semantics<parallel>, #tpu.dimension_semantics<arbitrary>], iteration_bounds = array<i64: 2, 1>, scalar_prefetch = 0 : i64, scratch_operands = 2 : i64, tpu.core_type = #tpu.core_type<tc>, window_params = [{transform_indices = @transform_0, window_bounds = array<i64: 1, 16, 128>}, {pipeline_mode = #tpu.pipeline_mode<synchronous>, transform_indices = @transform_1, window_bounds = array<i64: 128, 128>}, {pipeline_mode = #tpu.pipeline_mode<synchronous>, transform_indices = @transform_2, window_bounds = array<i64: 128, 128>}, {pipeline_mode = #tpu.pipeline_mode<synchronous>, transform_indices = @transform_3, window_bounds = array<i64: 128, 128>}, {pipeline_mode = #tpu.pipeline_mode<synchronous>, transform_indices = @transform_4, window_bounds = array<i64: 1, 128>}, {pipeline_mode = #tpu.pipeline_mode<synchronous>, transform_indices = @transform_5, window_bounds = array<i64: 1, 128>}, {pipeline_mode = #tpu.pipeline_mode<synchronous>, transform_indices = @transform_6, window_bounds = array<i64: 1, 128>}, {transform_indices = @transform_7, window_bounds = array<i64: 1, 16, 128>}]} {
    %c0_i32 = arith.constant 0 : i32
    %0 = arith.cmpi eq, %arg1, %c0_i32 : i32
    %1 = arith.extui %0 : i1 to i32
    %c0_i32_0 = arith.constant 0 : i32
    %2 = arith.cmpi ne, %1, %c0_i32_0 : i32
    scf.if %2 {
      %c0_21 = arith.constant 0 : index
      %c0_22 = arith.constant 0 : index
      %c0_23 = arith.constant 0 : index
      %44 = vector.load %arg2[%c0_21, %c0_22, %c0_23] : memref<1x16x128xbf16, #tpu.memory_space<vmem>>, vector<1x16x128xbf16>
      %45 = vector.shape_cast %44 : vector<1x16x128xbf16> to vector<16x128xbf16>
      %c0_24 = arith.constant 0 : index
      %c0_25 = arith.constant 0 : index
      %46 = vector.load %arg4[%c0_24, %c0_25] : memref<128x128xbf16, #tpu.memory_space<vmem>>, vector<128x128xbf16>
      %cst_26 = arith.constant dense<0.000000e+00> : vector<16x128xf32>
      %47 = tpu.matmul %45, %46, %cst_26 {dimension_numbers = #tpu.dot_dimension_numbers<[1], [0], [0], [1], [0, 0, 1, 1], [], []>} : vector<16x128xbf16>, vector<128x128xbf16>, vector<16x128xf32> -> vector<16x128xf32>
      %c0_27 = arith.constant 0 : index
      %c0_28 = arith.constant 0 : index
      %48 = vector.load %arg7[%c0_27, %c0_28] : memref<1x128xf32, #tpu.memory_space<vmem>>, vector<1x128xf32>
      %49 = vector.broadcast %48 : vector<1x128xf32> to vector<16x128xf32>
      %50 = arith.addf %47, %49 : vector<16x128xf32>
      %c0_29 = arith.constant 0 : index
      %c0_30 = arith.constant 0 : index
      %51 = vector.load %arg5[%c0_29, %c0_30] : memref<128x128xbf16, #tpu.memory_space<vmem>>, vector<128x128xbf16>
      %cst_31 = arith.constant dense<0.000000e+00> : vector<16x128xf32>
      %52 = tpu.matmul %45, %51, %cst_31 {dimension_numbers = #tpu.dot_dimension_numbers<[1], [0], [0], [1], [0, 0, 1, 1], [], []>} : vector<16x128xbf16>, vector<128x128xbf16>, vector<16x128xf32> -> vector<16x128xf32>
      %c0_32 = arith.constant 0 : index
      %c0_33 = arith.constant 0 : index
      %53 = vector.load %arg8[%c0_32, %c0_33] : memref<1x128xf32, #tpu.memory_space<vmem>>, vector<1x128xf32>
      %54 = vector.broadcast %53 : vector<1x128xf32> to vector<16x128xf32>
      %55 = arith.addf %52, %54 : vector<16x128xf32>
      %56 = arith.truncf %50 : vector<16x128xf32> to vector<16x128xbf16>
      %57 = arith.truncf %55 : vector<16x128xf32> to vector<16x128xbf16>
      %58 = vector.extract_strided_slice %56 {offsets = [0, 0], sizes = [16, 64], strides = [1, 1]} : vector<16x128xbf16> to vector<16x64xbf16>
      %c0_34 = arith.constant 0 : index
      %c0_35 = arith.constant 0 : index
      %c0_36 = arith.constant 0 : index
      %59 = vector.load %arg10[%c0_34, %c0_35, %c0_36] : memref<2x16x64xbf16, #tpu.memory_space<vmem>>, vector<1x16x64xbf16>
      %60 = vector.shape_cast %59 : vector<1x16x64xbf16> to vector<16x64xbf16>
      %61 = vector.shape_cast %58 : vector<16x64xbf16> to vector<1x16x64xbf16>
      tpu.vector_store %arg10[%c0_34, %c0_35, %c0_36], %61 {strides = array<i32>} : memref<2x16x64xbf16, #tpu.memory_space<vmem>>, vector<1x16x64xbf16>,
      %62 = vector.extract_strided_slice %57 {offsets = [0, 0], sizes = [16, 64], strides = [1, 1]} : vector<16x128xbf16> to vector<16x64xbf16>
      %c0_37 = arith.constant 0 : index
      %c0_38 = arith.constant 0 : index
      %c0_39 = arith.constant 0 : index
      %63 = vector.load %arg11[%c0_37, %c0_38, %c0_39] : memref<2x16x64xbf16, #tpu.memory_space<vmem>>, vector<1x16x64xbf16>
      %64 = vector.shape_cast %63 : vector<1x16x64xbf16> to vector<16x64xbf16>
      %65 = vector.shape_cast %62 : vector<16x64xbf16> to vector<1x16x64xbf16>
      tpu.vector_store %arg11[%c0_37, %c0_38, %c0_39], %65 {strides = array<i32>} : memref<2x16x64xbf16, #tpu.memory_space<vmem>>, vector<1x16x64xbf16>,
      %66 = vector.extract_strided_slice %56 {offsets = [0, 64], sizes = [16, 64], strides = [1, 1]} : vector<16x128xbf16> to vector<16x64xbf16>
      %c1 = arith.constant 1 : index
      %c0_40 = arith.constant 0 : index
      %c0_41 = arith.constant 0 : index
      %67 = vector.load %arg10[%c1, %c0_40, %c0_41] : memref<2x16x64xbf16, #tpu.memory_space<vmem>>, vector<1x16x64xbf16>
      %68 = vector.shape_cast %67 : vector<1x16x64xbf16> to vector<16x64xbf16>
      %69 = vector.shape_cast %66 : vector<16x64xbf16> to vector<1x16x64xbf16>
      tpu.vector_store %arg10[%c1, %c0_40, %c0_41], %69 {strides = array<i32>} : memref<2x16x64xbf16, #tpu.memory_space<vmem>>, vector<1x16x64xbf16>,
      %70 = vector.extract_strided_slice %57 {offsets = [0, 64], sizes = [16, 64], strides = [1, 1]} : vector<16x128xbf16> to vector<16x64xbf16>
      %c1_42 = arith.constant 1 : index
      %c0_43 = arith.constant 0 : index
      %c0_44 = arith.constant 0 : index
      %71 = vector.load %arg11[%c1_42, %c0_43, %c0_44] : memref<2x16x64xbf16, #tpu.memory_space<vmem>>, vector<1x16x64xbf16>
      %72 = vector.shape_cast %71 : vector<1x16x64xbf16> to vector<16x64xbf16>
      %73 = vector.shape_cast %70 : vector<16x64xbf16> to vector<1x16x64xbf16>
      tpu.vector_store %arg11[%c1_42, %c0_43, %c0_44], %73 {strides = array<i32>} : memref<2x16x64xbf16, #tpu.memory_space<vmem>>, vector<1x16x64xbf16>,
    } else {
    }
    %c16_i32 = arith.constant 16 : i32
    %3 = arith.muli %arg1, %c16_i32 : i32
    %4 = tpu.assume_multiple %3, 16 : i32
    %c0 = arith.constant 0 : index
    %5 = arith.index_cast %4 : i32 to index
    %c0_1 = arith.constant 0 : index
    %6 = vector.load %arg2[%c0, %5, %c0_1] : memref<1x16x128xbf16, #tpu.memory_space<vmem>>, vector<1x16x128xbf16>
    %7 = vector.shape_cast %6 : vector<1x16x128xbf16> to vector<16x128xbf16>
    %c0_2 = arith.constant 0 : index
    %c0_3 = arith.constant 0 : index
    %8 = vector.load %arg3[%c0_2, %c0_3] : memref<128x128xbf16, #tpu.memory_space<vmem>>, vector<128x128xbf16>
    %cst = arith.constant dense<0.000000e+00> : vector<16x128xf32>
    %9 = tpu.matmul %7, %8, %cst {dimension_numbers = #tpu.dot_dimension_numbers<[1], [0], [0], [1], [0, 0, 1, 1], [], []>} : vector<16x128xbf16>, vector<128x128xbf16>, vector<16x128xf32> -> vector<16x128xf32>
    %c0_4 = arith.constant 0 : index
    %c0_5 = arith.constant 0 : index
    %10 = vector.load %arg6[%c0_4, %c0_5] : memref<1x128xf32, #tpu.memory_space<vmem>>, vector<1x128xf32>
    %11 = vector.broadcast %10 : vector<1x128xf32> to vector<16x128xf32>
    %12 = arith.addf %9, %11 : vector<16x128xf32>
    %13 = arith.truncf %12 : vector<16x128xf32> to vector<16x128xbf16>
    %14 = vector.extract_strided_slice %13 {offsets = [0, 0], sizes = [16, 64], strides = [1, 1]} : vector<16x128xbf16> to vector<16x64xbf16>
    %15 = vector.extract_strided_slice %13 {offsets = [0, 64], sizes = [16, 64], strides = [1, 1]} : vector<16x128xbf16> to vector<16x64xbf16>
    %16 = vector.shape_cast %14 : vector<16x64xbf16> to vector<1x16x64xbf16>
    %17 = vector.shape_cast %15 : vector<16x64xbf16> to vector<1x16x64xbf16>
    %18 = tpu.concatenate %16, %17 in 0 : vector<1x16x64xbf16>, vector<1x16x64xbf16> -> vector<2x16x64xbf16>
    %c0_6 = arith.constant 0 : index
    %c0_7 = arith.constant 0 : index
    %c0_8 = arith.constant 0 : index
    %19 = vector.load %arg10[%c0_6, %c0_7, %c0_8] : memref<2x16x64xbf16, #tpu.memory_space<vmem>>, vector<2x16x64xbf16>
    "tpu.trace_start"() <{level = 10 : i32, message = "hqd,hkd->hqk"}> : () -> ()
    %cst_9 = arith.constant dense<0.000000e+00> : vector<2x16x16xf32>
    %20 = tpu.matmul %18, %19, %cst_9 {dimension_numbers = #tpu.dot_dimension_numbers<[2], [2], [1], [1], [0, 0, 0, 1, 1, 1], [0], [0]>} : vector<2x16x64xbf16>, vector<2x16x64xbf16>, vector<2x16x16xf32> -> vector<2x16x16xf32>
    "tpu.trace_stop"() : () -> ()
    %cst_10 = arith.constant dense<0xFF800000> : vector<2x16xf32>
    %21 = vector.multi_reduction <maximumf>, %20, %cst_10 [2] : vector<2x16x16xf32> to vector<2x16xf32>
    %22 = vector.shape_cast %21 : vector<2x16xf32> to vector<2x16x1xf32>
    %23 = vector.broadcast %22 : vector<2x16x1xf32> to vector<2x16x16xf32>
    %24 = arith.subf %20, %23 : vector<2x16x16xf32>
    %25 = math.exp %24 : vector<2x16x16xf32>
    %cst_11 = arith.constant dense<0.000000e+00> : vector<2x16xf32>
    %26 = vector.multi_reduction <add>, %25, %cst_11 [2] : vector<2x16x16xf32> to vector<2x16xf32>
    %27 = vector.shape_cast %26 : vector<2x16xf32> to vector<2x16x1xf32>
    %28 = arith.truncf %25 : vector<2x16x16xf32> to vector<2x16x16xbf16>
    %c0_12 = arith.constant 0 : index
    %c0_13 = arith.constant 0 : index
    %c0_14 = arith.constant 0 : index
    %29 = vector.load %arg11[%c0_12, %c0_13, %c0_14] : memref<2x16x64xbf16, #tpu.memory_space<vmem>>, vector<2x16x64xbf16>
    "tpu.trace_start"() <{level = 10 : i32, message = "hqk,hkd->hqd"}> : () -> ()
    %cst_15 = arith.constant dense<0.000000e+00> : vector<2x16x64xf32>
    %30 = tpu.matmul %28, %29, %cst_15 {dimension_numbers = #tpu.dot_dimension_numbers<[2], [1], [1], [2], [0, 0, 0, 1, 1, 2], [0], [0]>} : vector<2x16x16xbf16>, vector<2x16x64xbf16>, vector<2x16x64xf32> -> vector<2x16x64xf32>
    "tpu.trace_stop"() : () -> ()
    %31 = tpu.reciprocal %27 {approx = true} : vector<2x16x1xf32> -> vector<2x16x1xf32>
    %32 = vector.broadcast %31 : vector<2x16x1xf32> to vector<2x16x64xf32>
    %33 = arith.mulf %30, %32 : vector<2x16x64xf32>
    %34 = vector.extract_strided_slice %33 {offsets = [0, 0, 0], sizes = [1, 16, 64], strides = [1, 1, 1]} : vector<2x16x64xf32> to vector<1x16x64xf32>
    %35 = vector.shape_cast %34 : vector<1x16x64xf32> to vector<16x64xf32>
    %c0_16 = arith.constant 0 : index
    %c0_17 = arith.constant 0 : index
    %c0_18 = arith.constant 0 : index
    %36 = vector.load %arg9[%c0_16, %c0_17, %c0_18] : memref<1x16x128xf32, #tpu.memory_space<vmem>>, vector<1x16x64xf32>
    %37 = vector.shape_cast %36 : vector<1x16x64xf32> to vector<16x64xf32>
    %38 = vector.shape_cast %35 : vector<16x64xf32> to vector<1x16x64xf32>
    tpu.vector_store %arg9[%c0_16, %c0_17, %c0_18], %38 {strides = array<i32>} : memref<1x16x128xf32, #tpu.memory_space<vmem>>, vector<1x16x64xf32>,
    %39 = vector.extract_strided_slice %33 {offsets = [1, 0, 0], sizes = [1, 16, 64], strides = [1, 1, 1]} : vector<2x16x64xf32> to vector<1x16x64xf32>
    %40 = vector.shape_cast %39 : vector<1x16x64xf32> to vector<16x64xf32>
    %c0_19 = arith.constant 0 : index
    %c0_20 = arith.constant 0 : index
    %c64 = arith.constant 64 : index
    %41 = vector.load %arg9[%c0_19, %c0_20, %c64] : memref<1x16x128xf32, #tpu.memory_space<vmem>>, vector<1x16x64xf32>
    %42 = vector.shape_cast %41 : vector<1x16x64xf32> to vector<16x64xf32>
    %43 = vector.shape_cast %40 : vector<16x64xf32> to vector<1x16x64xf32>
    tpu.vector_store %arg9[%c0_19, %c0_20, %c64], %43 {strides = array<i32>} : memref<1x16x128xf32, #tpu.memory_space<vmem>>, vector<1x16x64xf32>,
    return
  }
  func.func @transform_0(%arg0: i32, %arg1: i32) -> (i32, i32, i32) {
    %c0_i32 = arith.constant 0 : i32
    %c0_i32_0 = arith.constant 0 : i32
    %c0_i32_1 = arith.constant 0 : i32
    return %arg0, %c0_i32, %c0_i32_0 : i32, i32, i32
  }
  func.func @transform_1(%arg0: i32, %arg1: i32) -> (i32, i32) {
    %c0_i32 = arith.constant 0 : i32
    %c0_i32_0 = arith.constant 0 : i32
    %c0_i32_1 = arith.constant 0 : i32
    return %c0_i32, %c0_i32_0 : i32, i32
  }
  func.func @transform_2(%arg0: i32, %arg1: i32) -> (i32, i32) {
    %c0_i32 = arith.constant 0 : i32
    %c0_i32_0 = arith.constant 0 : i32
    %c0_i32_1 = arith.constant 0 : i32
    return %c0_i32, %c0_i32_0 : i32, i32
  }
  func.func @transform_3(%arg0: i32, %arg1: i32) -> (i32, i32) {
    %c0_i32 = arith.constant 0 : i32
    %c0_i32_0 = arith.constant 0 : i32
    %c0_i32_1 = arith.constant 0 : i32
    return %c0_i32, %c0_i32_0 : i32, i32
  }
  func.func @transform_4(%arg0: i32, %arg1: i32) -> (i32, i32) {
    %c0_i32 = arith.constant 0 : i32
    %c0_i32_0 = arith.constant 0 : i32
    %c0_i32_1 = arith.constant 0 : i32
    return %c0_i32, %c0_i32_0 : i32, i32
  }
  func.func @transform_5(%arg0: i32, %arg1: i32) -> (i32, i32) {
    %c0_i32 = arith.constant 0 : i32
    %c0_i32_0 = arith.constant 0 : i32
    %c0_i32_1 = arith.constant 0 : i32
    return %c0_i32, %c0_i32_0 : i32, i32
  }
  func.func @transform_6(%arg0: i32, %arg1: i32) -> (i32, i32) {
    %c0_i32 = arith.constant 0 : i32
    %c0_i32_0 = arith.constant 0 : i32
    %c0_i32_1 = arith.constant 0 : i32
    return %c0_i32, %c0_i32_0 : i32, i32
  }
  func.func @transform_7(%arg0: i32, %arg1: i32) -> (i32, i32, i32) {
    %c0_i32 = arith.constant 0 : i32
    %c0_i32_0 = arith.constant 0 : i32
    return %arg0, %arg1, %c0_i32 : i32, i32, i32
  }
}

</mosaic_0001>

<bundles_post_ra>
// kernel: tpu_custom_call.1
= control target key start
LH: loop header
LB: loop body
LE: loop exit
PB: predicated region body
PF: predicated region fallthrough
CT: control target
= control target key end

     0   :  { %s1772_s0 = inlined_call_operand.hbm [shape: bf16[2,16,128], index: 0, kind: input, shape index: {}]   ;;  %s1773_s1 = inlined_call_operand.hbm [shape: bf16[128,128], index: 1, kind: input, shape index: {}]   ;;  %s1774_s2 = inlined_call_operand.hbm [shape: bf16[128,128], index: 2, kind: input, shape index: {}]   ;;  %s1775_s3 = inlined_call_operand.hbm [shape: bf16[128,128], index: 3, kind: input, shape index: {}]   ;;  %s1776_s4 = inlined_call_operand.vmem [shape: f32[1,128], index: 4, kind: input, shape index: {}]   ;;  %s1777_s5 = inlined_call_operand.vmem [shape: f32[1,128], index: 5, kind: input, shape index: {}]   ;;  %s1778_s6 = inlined_call_operand.vmem [shape: f32[1,128], index: 6, kind: input, shape index: {}]   ;;  %s1779_s7 = inlined_call_operand.hbm [shape: f32[2,16,128], index: 7, kind: output, shape index: {}]  }
   0x1   :  { %1785 = sst [smem:[#allocation19_spill]] %s1773_s1 }
   0x2   :  { %1786 = sst [smem:[#allocation20_spill]] %s1774_s2 }
   0x3   :  { %1787 = sst [smem:[#allocation21_spill]] %s1775_s3 }
   0x4   :  { %12 = vsyncpa [#allocation5], 0 }
   0x5   :  { %14 = vsyncpa [#allocation5 + $0x1], 0 }
   0x6   :  { %15 = vsyncpa [#allocation8], 0 }
   0x7   :  { %16 = vsyncpa [#allocation11], 0 }
   0x8   :  { %17 = vsyncpa [#allocation6], 0 }
   0x9   :  { %19 = vsyncpa [#allocation6 + $0x1], 0  ;;  %s1545_s24 = smov 0   ;;  %s1547_s25 = smov 0  }
   0xa   :  { %s1549_s26 = smov 0   ;;  %s1551_s27 = smov 0  }
   0xb   :  { %s1553_s28 = smov 0   ;;  %s1555_s29 = smov 0  }
   0xc LB: > { %1788 = sst [smem:[#allocation17_spill]] %s1495_s29  ;;  %s991_s30 = sadd.s32 4294967295, %s1495_s29   ;;  %s1495_s29 = sphi %s1555_s29, %s25_s29   ;;  %s1491_s28 = sphi %s1553_s28, %s1809_s28   ;;  %s1487_s27 = sphi %s1551_s27, %s1808_s27   ;;  %s1483_s26 = sphi %s1549_s26, %s1807_s26   ;;  %s1479_s25 = sphi %s1547_s25, %s1806_s25   ;;  %s1475_s24 = sphi %s1545_s24, %s1805_s24  }
   0xd   : > { %s992_s8 = sadd.s32 4294967294, %s1495_s29   ;;  %p57_p0 = scmp.ne.s32.totalorder %s1479_s25, %s1475_s24 }
   0xe   : > { %p1579_p1 = scmp.eq.s32.totalorder %s991_s30, 0  ;;  %p1583_p2 = scmp.eq.s32.totalorder %s991_s30, 1 }
   0xf   : > { %p215_p3 = scmp.eq.s32.totalorder %s992_s8, 1  ;;  %p993_p5 = scmp.ge.s32.totalorder %s1495_s29, 1 }
  0x10   : > { %p1589_p4 = por %p1579_p1, %p57_p0  ;;  %p222_p7 = scmp.lt.s32.totalorder %s1495_s29, 3 }
  0x11   : > { %p1594_p6 = por %p215_p3, %p57_p0  ;;  %s1793_s1 = sld [smem:[#allocation19_spill]] }
  0x12   : > { %p1602_p8 = pnand %p993_p5, %p222_p7  ;;  %s1497_s17 = smov [#allocation7]  }
  0x13   : > { %s235_s18 = sshll.u32 %s1497_s17, 4  ;;  %p997_p11 = scmp.ge.s32.totalorder %s1495_s29, 2  ;;  %s236_s18 = int_to_ptr.vmem [resolvable:$true] %s235_s18 }
  0x14   : > { %p1184_p9 = pneg %p1602_p8  ;;  %s1796_s2 = sld [smem:[#allocation20_spill]] }
  0x15   : > { %s1780_s23 = smov 64   ;;  %s1781_s30 = smov 4  }
  0x16   : > { %p1610_p10 = pnand %p1184_p9, %p1579_p1  ;;  %s1500_s8 = smov [#allocation9]  }
  0x17   : > { %s233_s15 = sshll.u32 %s1793_s1, 4  ;;  %s249_s13 = sshll.u32 %s1500_s8, 4  ;;  %s234_s15 = int_to_ptr.hbm [resolvable:$true] %s233_s15  ;;  %s250_s13 = int_to_ptr.vmem [resolvable:$true] %s249_s13 }
  0x18   : > { %1187 = dma.hbm_to_vmem [thread:$0]  (!%p1610_p10), %s234_s15, 1024, %s236_s18, [#allocation8], %s1780_s23, %s1780_s23, %s1781_s30  }
  0x19   : > { %s1797_s3 = sld [smem:[#allocation21_spill]]  ;;  %s1501_s21 = smov [#allocation10]  }
  0x1a   : > { %s247_s22 = sshll.u32 %s1796_s2, 4  ;;  %s263_s1 = sshll.u32 %s1501_s21, 4  ;;  %s248_s22 = int_to_ptr.hbm [resolvable:$true] %s247_s22  ;;  %s264_s1 = int_to_ptr.vmem [resolvable:$true] %s263_s1 }
  0x1b   : > { %1190 = dma.hbm_to_vmem [thread:$0]  (!%p1610_p10), %s248_s22, 1024, %s250_s13, [#allocation8], %s1780_s23, %s1780_s23, %s1781_s30  }
  0x1c   : > { %s37_s15 = sadd.s32 1, %s1491_s28  ;;  %s44_s18 = sadd.s32 1, %s1483_s26 }
  0x1d   : > { %p39_p12 = scmp.ge.s32.totalorder %s37_s15, 2  ;;  %p51_p13 = scmp.ne.s32.totalorder %s1483_s26, %s1479_s25 }
  0x1e   : > { %p52_p0 = scmp.eq.s32.totalorder %s1495_s29, 0  ;;  %p1205_p7 = scmp.lt.s32.totalorder %s1495_s29, 2 }
  0x1f   : > { %s261_s20 = sshll.u32 %s1797_s3, 4  ;;  %s1811_s15 = smov (%p39_p12, %s37_s15), 0  ;;  %s262_s20 = int_to_ptr.hbm [resolvable:$true] %s261_s20 }
  0x20   : > { %1193 = dma.hbm_to_vmem [thread:$0]  (!%p1610_p10), %s262_s20, 1024, %s264_s1, [#allocation11], %s1780_s23, %s1780_s23, %s1781_s30  }
  0x21   : > { %1798 = sst [smem:[#allocation18_spill]] %s1811_s15  ;;  %p1643_p3 = por %p52_p0, %p51_p13 }
  0x22   : > { %p1649_p5 = por %p1583_p2, %p51_p13  ;;  %s41_s8 = ssub.s32 %s1491_s28, %s1811_s15 }
  0x23   : > { %p42_p9 = scmp.eq.s32.totalorder %s41_s8, 0  ;;  %s286_s1 = sand.u32 1, %s1483_s26  }
  0x24   : > { %s998_s13 = sshll.u32 %s286_s1, 3  ;;  %s1136_s17 = sshll.u32 %s1491_s28, 3 }
  0x25   : > { %s1658_s14 = scalar_select %p42_p9, %s1483_s26, %s44_s18  }
  0x26   : > { %s295_s23 = scalar_lea.hbm %s1772_s0, %s1136_s17  ;;  %s290_s30 = scalar_lea.vmem [#allocation4], %s998_s13 }
  0x27   : > { %s298_s2 = sshll.u32 %s290_s30, 4  ;;  %s296_s10 = sshll.u32 %s295_s23, 4  ;;  %s299_s2 = int_to_ptr.vmem [resolvable:$true] %s298_s2  ;;  %s297_s10 = int_to_ptr.hbm [resolvable:$true] %s296_s10 }
  0x28   : > { %p1195_p2 = pnand %p1205_p7, %p1643_p3  ;;  %s287_s3 = scalar_lea.sflag [#allocation5], %s286_s1 }
  0x29   : > { %s1801_s15 = smov 4   ;;  %s1802_s29 = smov 64  }
  0x2a   : > { %1197 = dma.hbm_to_vmem [thread:$0]  (!%p1195_p2), %s297_s10, 128, %s299_s2, %s287_s3, %s1802_s29, %s1802_s29, %s1801_s15  }
  0x2b   : > { %310 = sbr.rel (%p1602_p8) target bundleno = 883 (0x373), region = 48  ;;  %s1672_s18 = sand.u32 (!%p1602_p8), 1, %s1479_s25  }
  0x2c   : > { %s1002_s30 = sshll.u32 (!%p1602_p8), %s1672_s18, 3  ;;  %s313_s23 = scalar_lea.sflag (!%p1602_p8), [#allocation5], %s1672_s18 }
  0x2d   : > { %s1676_s8 = scalar_lea.vmem (!%p1602_p8), [#allocation4], %s1002_s30 }
  0x30   : > { %1458 = dma.done.wait (%p1589_p4), %s313_s23, 128  }
  0x31   : > { %1460 = vsyncadd (%p1589_p4), %s313_s23, 4294967168 }
  0x32   : > { %1462 = dma.done.wait (%p1579_p1), [#allocation8], 2048  }
  0x33   : > { %1464 = vsyncadd (%p1579_p1), [#allocation8], 4294965248 }
  0x34   : > { %1466 = dma.done.wait (%p1579_p1), [#allocation11], 1024  }
  0x35   : > { %1468 = vsyncadd (%p1579_p1), [#allocation11], 4294966272  ;;  %v1145_v0 = vld [vmem:[#allocation9 + $0x38] sm:$0xff]  ;;  %v1144_v2 = vld [vmem:[#allocation9 + $0x30] sm:$0xff]  ;;  %vm545_vm0 = vcmask 519168   ;;  %s1502_s11 = smov 64  }
  0x36   : > { %v1162_v1 = vld [vmem:[#allocation7 + $0x38] sm:$0xff]  ;;  %445 = vmatpush.bf16.msra.mxu0 %v1145_v0  ;;  %v1161_v3 = vld [vmem:[#allocation7 + $0x30] sm:$0xff]  ;;  %v1143_v4 = vld [vmem:[#allocation9 + $0x28] sm:$0xff]  ;;  %vm687_vm1 = vcmask 523264   ;;  %vm736_vm2 = vcmask 130048   ;;  %s1006_s22 = sshll.u32 %s1672_s18, 4 }
  0x37   : > { %653 = vmatpush.bf16.msra.mxu2 %v1162_v1  ;;  %v1153_v5 = vld [vmem:[#allocation10 + $0x38] sm:$0xff]  ;;  %v1160_v6 = vld [vmem:[#allocation7 + $0x28] sm:$0xff]  ;;  %v1152_v7 = vld [vmem:[#allocation10 + $0x30] sm:$0xff]  ;;  %s362_s1 = scalar_lea.vmem [#allocation12], %s1006_s22  ;;  %vm855_vm3 = vcmask 1048064   ;;  %s1167_s13 = sshll.u32 %s1487_s27, 4 }
  0x38   : > { %527 = vmatpush.bf16.msra.mxu1 %v1153_v5  ;;  %v1142_v8 = vld [vmem:[#allocation9 + $0x20] sm:$0xff]  ;;  %v1151_v10 = vld [vmem:[#allocation10 + $0x28] sm:$0xff]  ;;  %v1141_v11 = vld [vmem:[#allocation9 + $0x18] sm:$0xff]  ;;  %s872_s21 = scalar_lea.hbm %s1779_s7, %s1167_s13  ;;  %s873_s10 = sshll.u32 %s362_s1, 4  ;;  %s874_s10 = int_to_ptr.vmem [resolvable:$true] %s873_s10 }
  0x39   : > { %v1159_v9 = vld [vmem:[#allocation7 + $0x20] sm:$0xff]  ;;  %v1158_v12 = vld [vmem:[#allocation7 + $0x18] sm:$0xff]  ;;  %v1140_v14 = vld [vmem:[#allocation9 + $0x10] sm:$0xff]  ;;  %s875_s30 = sshll.u32 %s872_s21, 4  ;;  %s859_s23 = scalar_lea.sflag [#allocation6], %s1672_s18  ;;  %s876_s30 = int_to_ptr.hbm [resolvable:$true] %s875_s30 }
  0x3a   : > { %446 = vmatpush.bf16.msra.mxu0 %v1144_v2  ;;  %v1150_v13 = vld [vmem:[#allocation10 + $0x20] sm:$0xff]  ;;  %v1157_v15 = vld [vmem:[#allocation7 + $0x10] sm:$0xff]  ;;  %v1149_v16 = vld [vmem:[#allocation10 + $0x18] sm:$0xff]  ;;  %s1425_s29 = scalar_lea.hbm %s1779_s7, 32 }
  0x3b   : > { %654 = vmatpush.bf16.msra.mxu2 %v1161_v3  ;;  %v1139_v17 = vld [vmem:[#allocation9 + $0x8] sm:$0xff]  ;;  %v1148_v19 = vld [vmem:[#allocation10 + $0x10] sm:$0xff]  ;;  %v1138_v20 = vld [vmem:[#allocation9] sm:$0xff] }
  0x3c   : > { %528 = vmatpush.bf16.msra.mxu1 %v1152_v7  ;;  %v1156_v18 = vld [vmem:[#allocation7 + $0x8] sm:$0xff]  ;;  %v1155_v21 = vld [vmem:[#allocation7] sm:$0xff]  ;;  %v1137_v23 = vld [vmem:[%s1676_s8] sm:$0xff] }
  0x3d   : > { %v1147_v22 = vld [vmem:[#allocation10 + $0x8] sm:$0xff]  ;;  %v1154_v24 = vld [vmem:[%s1676_s8] sm:$0xff]  ;;  %v1146_v25 = vld [vmem:[#allocation10] sm:$0xff]  ;;  %s1419_s8 = sshra.s32 %s876_s30, 4  ;;  %s1420_s8 = int_to_ptr.hbm [resolvable:$true] %s1419_s8 }
  0x3e   : > { %447 = vmatpush.bf16.msra.mxu0 %v1143_v4  ;;  %v1266_v26 = vld [vmem:[%s1777_s5] ss:$0 sm:$0xff]  ;;  %s1421_s2 = scalar_lea.hbm %s1420_s8, 16  ;;  %p1426_p10 = scmp.lt.s32.totalorder %s1420_s8, %s1779_s7 }
  0x3f   : > { %655 = vmatpush.bf16.msra.mxu2 %v1160_v6  ;;  %v1267_v30 = vld [vmem:[%s1776_s4] ss:$0 sm:$0xff]  ;;  %p1422_p1 = scmp.ne.s32.totalorder %s1420_s8, %s1421_s2  ;;  %p1427_p12 = scmp.lt.s32.totalorder %s1425_s29, %s1421_s2 }
  0x40   : > { %529 = vmatpush.bf16.msra.mxu1 %v1151_v10  ;;  %v1268_v45 = vld [vmem:[%s1778_s6] ss:$0 sm:$0xff] }
  0x41   : > { %p1423_p4 = pnand %p1422_p1, %p1649_p5  ;;  %p1428_p13 = por %p1427_p12, %p1426_p10 }
  0x42   : > { %448 = vmatpush.bf16.msra.mxu0 %v1142_v8 }
  0x43   : > { %656 = vmatpush.bf16.msra.mxu2 %v1159_v9  ;;  %p1424_p8 = pneg %p1423_p4 }
  0x44   : > { %530 = vmatpush.bf16.msra.mxu1 %v1150_v13 }
  0x45   : > { %p1429_p0 = pnand %p1428_p13, %p1424_p8 }
  0x46   : > { %449 = vmatpush.bf16.msra.mxu0 %v1141_v11 }
  0x47   : > { %657 = vmatpush.bf16.msra.mxu2 %v1158_v12 }
  0x48   : > { %531 = vmatpush.bf16.msra.mxu1 %v1149_v16 }
  0x4a   : > { %450 = vmatpush.bf16.msra.mxu0 %v1140_v14 }
  0x4b   : > { %658 = vmatpush.bf16.msra.mxu2 %v1157_v15 }
  0x4c   : > { %532 = vmatpush.bf16.msra.mxu1 %v1148_v19 }
  0x4e   : > { %451 = vmatpush.bf16.msra.mxu0 %v1139_v17 }
  0x4f   : > { %659 = vmatpush.bf16.msra.mxu2 %v1156_v18 }
  0x50   : > { %533 = vmatpush.bf16.msra.mxu1 %v1147_v22 }
  0x52   : > { %452 = vmatpush.bf16.msra.mxu0 %v1138_v20 }
  0x53   : > { %660 = vmatpush.bf16.msra.mxu2 %v1155_v21 }
  0x54   : > { %534 = vmatpush.bf16.msra.mxu1 %v1146_v25 }
  0x55   : > { %453 = vmatmul.bf16.vlgmr.msra.gmra.mxu0 %v1137_v23 }
  0x56   : > { %661 = vmatmul.bf16.vlgmr.msra.gmra.mxu2 %v1154_v24 }
  0x57   : > { %535 = vmatmul.bf16.vlgmr.msra.gmra.mxu1 %v1137_v23 }
  0xd2   : > { %v454_v27 = vpop.f32.mrf.mxu0 }
  0xd3   : > { %v455_v28 = vadd.f32 %v1266_v26, %v454_v27 }
  0xd4   : > { %v536_v46 = vpop.f32.mrf.mxu1 }
  0xd5   : > { %v541_v29 = vpack.c.bf16 %v455_v28, %v455_v28  ;;  %v537_v47 = vadd.f32 %v1268_v45, %v536_v46 }
  0xd7   : > { %546 = vst.msk [vmem:[#allocation2] sm:$0xf] %vm545_vm0, %v541_v29  ;;  %552 = vrot.lane.b32.xlu0 %v541_v29, %s1502_s11  ;;  %v543_v48 = vpack.c.bf16 %v537_v47, %v537_v47 }
  0xd9   : > { %v662_v31 = vpop.f32.mrf.mxu2  ;;  %548 = vst.msk [vmem:[#allocation3] sm:$0xf] %vm545_vm0, %v543_v48 }
  0xda   : > { %v456_v32 = vpop.f32.mrf.mxu0  ;;  %v663_v33 = vadd.f32 %v1267_v30, %v662_v31 }
  0xdb   : > { %v457_v34 = vadd.f32 %v1266_v26, %v456_v32 }
  0xdc   : > { %v667_v35 = vpack.c.bf16 %v663_v33, %v663_v33  ;;  %v538_v57 = vpop.f32.mrf.mxu1 }
  0xdd   : > { %v542_v36 = vpack.c.bf16 %v457_v34, %v457_v34  ;;  %v539_v58 = vadd.f32 %v1268_v45, %v538_v57 }
  0xde   : > { %671 = vrot.lane.b32.xlu1 %v667_v35, %s1502_s11  ;;  %v679_v42 = vunpack.c.l.b16 %v667_v35 }
  0xdf   : > { %547 = vst.msk [vmem:[#allocation2 + $0x4] sm:$0xf] %vm545_vm0, %v542_v36  ;;  %554 = vrot.lane.b32.xlu0 %v542_v36, %s1502_s11  ;;  %v544_v59 = vpack.c.bf16 %v539_v58, %v539_v58 }
  0xe1   : > { %v664_v37 = vpop.f32.mrf.mxu2  ;;  %549 = vst.msk [vmem:[#allocation3 + $0x4] sm:$0xf] %vm545_vm0, %v544_v59 }
  0xe2   : > { %v665_v38 = vadd.f32 %v1267_v30, %v664_v37 }
  0xe4   : > { %v668_v39 = vpack.c.bf16 %v665_v38, %v665_v38 }
  0xe6   : > { %v1163_v40 = vld [vmem:[#allocation2] sm:$0xff]  ;;  %673 = vrot.lane.b32.xlu1 %v668_v39, %s1502_s11  ;;  %v680_v43 = vunpack.c.l.b16 %v668_v39 }
  0xe7   : > { %v692_v41 = vsel %vm687_vm1, %v1163_v40, 0  ;;  %563 = vrot.lane.b32.xlu0 %v543_v48, %s1502_s11 }
  0xe8   : > { %701 = vmatpush.bf16.xpose.msra.mxu3 %v692_v41  ;;  %v681_v44 = vpack.c.b16 %v680_v43, %v679_v42  ;;  %v1165_v1 = vld [vmem:[#allocation3] sm:$0xff] }
  0xee   : > { %565 = vrot.lane.b32.xlu1 %v544_v59, %s1502_s11 }
  0xef   : > { %1115 = vmatmul.msk.bf16.vlgmr.msra.gmra.mxu3 %vm687_vm1, %v681_v44 }
 0x149   : > { %v553_v49 = vpop.permute.xlu0 %552 }
 0x14a   : > { %559 = vst.msk [vmem:[#allocation2 + $0x8] sm:$0xf] %vm545_vm0, %v553_v49 }
 0x150   : > { %v672_v50 = vpop.permute.xlu1 %671 }
 0x151   : > { %v555_v51 = vpop.permute.xlu0 %554  ;;  %v708_v55 = vunpack.c.l.b16 %v672_v50 }
 0x152   : > { %560 = vst.msk [vmem:[#allocation2 + $0xc] sm:$0xf] %vm545_vm0, %v555_v51 }
 0x158   : > { %v674_v53 = vpop.permute.xlu1 %673 }
 0x159   : > { %v1164_v52 = vld [vmem:[#allocation2 + $0x8] sm:$0xff]  ;;  %v709_v56 = vunpack.c.l.b16 %v674_v53  ;;  %v564_v0 = vpop.permute.xlu0 %563 }
 0x15a   : > { %v720_v54 = vsel %vm687_vm1, %v1164_v52, 0  ;;  %570 = vst.msk [vmem:[#allocation3 + $0x8] sm:$0xf] %vm545_vm0, %v564_v0 }
 0x15b   : > { %729 = vmatpush.bf16.xpose.msrb.mxu3 %v720_v54  ;;  %v710_v60 = vpack.c.b16 %v709_v56, %v708_v55 }
 0x160   : > { %v566_v2 = vpop.permute.xlu1 %565 }
 0x161   : > { %571 = vst.msk [vmem:[#allocation3 + $0xc] sm:$0xf] %vm545_vm0, %v566_v2 }
 0x162   : > { %1120 = vmatmul.msk.bf16.vlgmr.msrb.gmra.mxu3 %vm687_vm1, %v710_v60 }
 0x163   : > { %802 = vmatpush.bf16.msra.mxu3 %v1165_v1 }
 0x168   : > { %v1166_v8 = vld [vmem:[#allocation3 + $0x8] sm:$0xff] }
 0x169   : > { %830 = vmatpush.bf16.msrb.mxu0 %v1166_v8 }
 0x172   : > { %v703_v61 = vpop.f32.mrf.mxu3 }
 0x173   : > { %v737_v7 = vsel %vm736_vm2, %v703_v61, -inf }
 0x17a   : > { %v705_v62 = vpop.f32.mrf.mxu3 }
 0x17b   : > { %v740_v63 = vsel %vm736_vm2, %v705_v62, -inf }
 0x17c   : > { %741 = vmax.xlane.f32.xlu0 %v740_v63 }
 0x1e5   : > { %v731_v3 = vpop.f32.mrf.mxu3 }
 0x1e6   : > { %v743_v4 = vsel %vm736_vm2, %v731_v3, -inf }
 0x1e7   : > { %744 = vmax.xlane.f32.xlu2 %v743_v4 }
 0x1ed   : > { %v733_v5 = vpop.f32.mrf.mxu3 }
 0x1ee   : > { %v746_v6 = vsel %vm736_vm2, %v733_v5, -inf }
 0x1ef   : > { %747 = vmax.xlane.f32.xlu2 %v746_v6  ;;  %v742_v12 = vpop.xlane.xlu0 %741 }
 0x1f0   : > { %v750_v14 = vsub.f32 %v705_v62, %v742_v12 }
 0x1f2   : > { %v755_v19 = vmul.f32 1.442695, %v750_v14 }
 0x1f7   : > { %738 = vmax.xlane.f32.xlu2 %v737_v7 }
 0x25a   : > { %v745_v9 = vpop.xlane.xlu2 %744 }
 0x25b   : > { %v751_v10 = vsub.f32 %v731_v3, %v745_v9 }
 0x25d   : > { %v757_v11 = vmul.f32 1.442695, %v751_v10 }
 0x25f   : > { %1269 = vpow2.f32 %v757_v11 }
 0x262   : > { %v748_v13 = vpop.xlane.xlu2 %747 }
 0x263   : > { %v752_v15 = vsub.f32 %v733_v5, %v748_v13 }
 0x265   : > { %v1270_v16 = vpop.eup %1269  ;;  %v759_v17 = vmul.f32 1.442695, %v752_v15 }
 0x266   : > { %v767_v18 = vsel %vm736_vm2, %v1270_v16, 0.0  ;;  %v775_v22 = vpack.c.bf16 %v1270_v16, %v1270_v16 }
 0x267   : > { %1271 = vpow2.f32 %v759_v17  ;;  %768 = vadd.xlane.f32.xlu1 %v767_v18 }
 0x268   : > { %1273 = vpow2.f32 %v755_v19  ;;  %v811_v26 = vunpack.c.l.b16 %v775_v22 }
 0x26a   : > { %v739_v20 = vpop.xlane.xlu2 %738 }
 0x26b   : > { %v749_v21 = vsub.f32 %v703_v61, %v739_v20 }
 0x26d   : > { %v1272_v23 = vpop.eup %1271  ;;  %v753_v24 = vmul.f32 1.442695, %v749_v21 }
 0x26e   : > { %v776_v25 = vpack.c.bf16 %v1272_v23, %v1272_v23  ;;  %v1274_v28 = vpop.eup %1273  ;;  %v770_v37 = vsel %vm736_vm2, %v1272_v23, 0.0 }
 0x26f   : > { %1275 = vpow2.f32 %v753_v24  ;;  %v774_v30 = vpack.c.bf16 %v1274_v28, %v1274_v28  ;;  %v764_v38 = vsel %vm736_vm2, %v1274_v28, 0.0 }
 0x270   : > { %v812_v27 = vunpack.c.l.b16 %v776_v25 }
 0x271   : > { %v784_v34 = vunpack.c.l.b16 %v774_v30 }
 0x272   : > { %v813_v29 = vpack.c.b16 %v812_v27, %v811_v26 }
 0x274   : > { %1130 = vmatmul.msk.bf16.vlgmr.msrb.gmra.mxu0 %vm736_vm2, %v813_v29 }
 0x275   : > { %v1276_v31 = vpop.eup %1275 }
 0x276   : > { %v773_v32 = vpack.c.bf16 %v1276_v31, %v1276_v31  ;;  %v761_v33 = vsel %vm736_vm2, %v1276_v31, 0.0 }
 0x277   : > { %762 = vadd.xlane.f32.xlu2 %v761_v33 }
 0x278   : > { %v783_v35 = vunpack.c.l.b16 %v773_v32 }
 0x27a   : > { %v785_v36 = vpack.c.b16 %v784_v34, %v783_v35 }
 0x27c   : > { %1125 = vmatmul.msk.bf16.vlgmr.msra.gmra.mxu3 %vm736_vm2, %v785_v36 }
 0x27f   : > { %771 = vadd.xlane.f32.xlu2 %v770_v37 }
 0x287   : > { %765 = vadd.xlane.f32.xlu2 %v764_v38 }
 0x2da   : > { %v769_v39 = vpop.xlane.xlu1 %768 }
 0x2db   : > { %1277 = vrcp.f32 %v769_v39 }
 0x2e1   : > { %v1278_v41 = vpop.eup %1277 }
 0x2ea   : > { %v763_v40 = vpop.xlane.xlu2 %762 }
 0x2f1   : > { %v832_v42 = vpop.f32.mrf.mxu0 }
 0x2f2   : > { %v843_v43 = vmul.f32 %v1278_v41, %v832_v42  ;;  %v772_v44 = vpop.xlane.xlu2 %771 }
 0x2f3   : > { %1279 = vrcp.f32 %v772_v44 }
 0x2f4   : > { %849 = vrot.lane.b32.xlu2 %v843_v43, %s1502_s11  ;;  %1281 = vrcp.f32 %v763_v40 }
 0x2f9   : > { %v1280_v45 = vpop.eup %1279  ;;  %v834_v46 = vpop.f32.mrf.mxu0 }
 0x2fa   : > { %v844_v47 = vmul.f32 %v1280_v45, %v834_v46  ;;  %v766_v48 = vpop.xlane.xlu2 %765  ;;  %v1282_v49 = vpop.eup %1281 }
 0x2fb   : > { %1283 = vrcp.f32 %v766_v48 }
 0x2fc   : > { %851 = vrot.lane.b32.xlu0 %v844_v47, %s1502_s11 }
 0x2ff   : > { %v804_v50 = vpop.f32.mrf.mxu3 }
 0x300   : > { %v841_v51 = vmul.f32 %v1282_v49, %v804_v50 }
 0x301   : > { %v1284_v52 = vpop.eup %1283 }
 0x302   : > { %845 = vst.msk [vmem:[%s362_s1] sm:$0xff] %vm687_vm1, %v841_v51 }
 0x307   : > { %v806_v53 = vpop.f32.mrf.mxu3 }
 0x308   : > { %v842_v54 = vmul.f32 %v1284_v52, %v806_v53 }
 0x30a   : > { %846 = vst.msk [vmem:[%s362_s1 + $0x8] sm:$0xff] %vm687_vm1, %v842_v54 }
 0x34e   : > { %v850_v55 = vpop.permute.xlu2 %849 }
 0x34f   : > { %856 = vst.msk [vmem:[%s362_s1] sm:$0xff] %vm855_vm3, %v850_v55 }
 0x36e   : > { %v852_v56 = vpop.permute.xlu0 %851 }
 0x36f   : > { %857 = vst.msk [vmem:[%s362_s1 + $0x8] sm:$0xff] %vm855_vm3, %v852_v56 }
 0x370   : > { %1432 = shalt.err (!%p1429_p0)
}
 0x371   : > { %s1503_s18 = smov 128   ;;  %s1504_s16 = smov 8  }
 0x372   : > { %1182 = dma.vmem_to_hbm [thread:$0]  (%p1649_p5), %s874_s10, 256, %s876_s30, %s859_s23, %s1503_s18, %s1503_s18, %s1504_s16  }
 0x373 PF: > { %s1803_s15 = sld [smem:[#allocation17_spill]]  ;;  %s890_s22 = sand.u32 1, %s1475_s24  }
 0x374   : > { %p1199_p3 = pnand %p997_p11, %p1594_p6  ;;  %s891_s1 = scalar_lea.sflag [#allocation6], %s890_s22 }
 0x376   : > { %p1200_p7 = pneg %p1199_p3 }
 0x378   : > { %1470 = dma.done.wait (%p1200_p7), %s891_s1, 256  }
 0x379   : > { %1472 = vsyncadd (%p1200_p7), %s891_s1, 4294967040  ;;  %s25_s29 = sadd.s32 1, %s1803_s15   ;;  %s1804_s19 = sld [smem:[#allocation18_spill]] }
 0x37a   : > { %p22_p9 = scmp.ge.s32.totalorder %s25_s29, 4   ;;  %s1805_s24 = smov %s1479_s25 }
 0x37b   : > { %s1806_s25 = smov %s1483_s26  ;;  %s1807_s26 = smov %s1658_s14 }
 0x37c   : > { %s1808_s27 = smov %s1491_s28  ;;  %24 = sbr.rel (!%p22_p9) target bundleno = 12 (0xc), region = 112 }
 0x37f   : > { %s1809_s28 = smov %s1804_s19 }
 0x381   :  { %897 = vsyncpa [#allocation5], 1 }
 0x382   :  { %899 = vsyncpa [#allocation5 + $0x1], 1 }
 0x383   :  { %900 = vsyncpa [#allocation8], 1 }
 0x384   :  { %901 = vsyncpa [#allocation11], 1 }
 0x385   :  { %902 = vsyncpa [#allocation6], 1 }
 0x386   :  { %904 = vsyncpa [#allocation6 + $0x1], 1 }

</bundles_post_ra>
